<compile_context>
chip_gen: v7x
topology: tpu7x:2x2x1
jax: 0.10.0
libtpu: 0.0.40
codegen_flags: <defaults>
</compile_context>

<pallas_src>
import numpy as np
import jax
import jax.numpy as jnp
from jax import lax
from jax.experimental import pallas as pl
from jax.experimental.pallas import tpu as pltpu

# ---- model / problem sizes (small, consistent with the module) --------------
B = 2            # batch
S = 16           # seq_len
H = 32           # hidden_size
NH = 4           # num_attention_heads
HD = H // NH     # head_dim
I = 64           # intermediate_size
EPS = 1e-5       # layer_norm_eps
CHUNK_SIZE = 10
LEFT_CONTEXT = 25
RIGHT_CONTEXT = 0
NEG_INF = -1e9   # stands in for float('-inf'); softmax result is identical

# Packed weight-slab column layout: every matrix starts on a 128-lane boundary.
CW_QKV = 0            # (H, 3H)  fused [Wq*scale | Wk | Wv]   (96 lanes, tile 0)
CW_O = 128            # (H, H)   out_proj
CW_1 = 256            # (H, I)   feed-forward in
CW_2 = 384            # (I, H)   feed-forward out
W_ROWS = max(H, I)    # 64
W_COLS = 512          # 4 lane tiles, each matrix tile-aligned

# Packed vector-slab row layout (width 128 lanes).
R_BQKV, R_BO, R_LN1G, R_LN1B, R_LN2G, R_LN2B, R_B1, R_B2 = range(8)
V_ROWS = 8


def _layer_norm(x, gamma, beta):
    mean = jnp.mean(x, axis=-1, keepdims=True)
    var = jnp.mean((x - mean) ** 2, axis=-1, keepdims=True)
    return (x - mean) * lax.rsqrt(var + EPS) * gamma + beta


def _streaming_chunk_mask():
    """In-kernel chunk streaming mask via iota compares (scales with any S).

    Replicates StreamingWav2Vec2Attention._create_chunk_attention_mask:
      allowed(i, j) = ( min(i - left_context, chunk_start) <= j < chunk_end )
                   or ( chunk_end <= j < i + right_context + 1 )
    """
    row = lax.broadcasted_iota(jnp.int32, (S, S), 0).astype(jnp.float32)
    col = lax.broadcasted_iota(jnp.int32, (S, S), 1).astype(jnp.float32)
    chunk_start = jnp.floor(row * (1.0 / CHUNK_SIZE)) * float(CHUNK_SIZE)
    chunk_end = jnp.minimum(chunk_start + float(CHUNK_SIZE), float(S))
    left_lo = jnp.minimum(row - float(LEFT_CONTEXT), chunk_start)
    right_hi = row + float(RIGHT_CONTEXT + 1)
    allowed = ((col >= left_lo) & (col < chunk_end)) | \
              ((col >= chunk_end) & (col < right_hi))
    return jnp.where(allowed, 0.0, NEG_INF).astype(jnp.float32)


def encoder_layer_kernel(x_ref, w_ref, v_ref, out_ref):
    x = x_ref[...]                                     # (S, H) f32

    bqkv = v_ref[R_BQKV:R_BQKV + 1, 0:3 * H]           # (1, 3H), q part pre-scaled
    bo = v_ref[R_BO:R_BO + 1, 0:H]
    ln1_g = v_ref[R_LN1G:R_LN1G + 1, 0:H]
    ln1_b = v_ref[R_LN1B:R_LN1B + 1, 0:H]
    ln2_g = v_ref[R_LN2G:R_LN2G + 1, 0:H]
    ln2_b = v_ref[R_LN2B:R_LN2B + 1, 0:H]
    b1 = v_ref[R_B1:R_B1 + 1, 0:I]
    b2 = v_ref[R_B2:R_B2 + 1, 0:H]

    # ---- pre-attention layer norm ----
    h = _layer_norm(x, ln1_g, ln1_b)

    # ---- fused QKV projection (scaling already folded into Wq/bq) ----
    qkv = jnp.dot(h, w_ref[0:H, CW_QKV:CW_QKV + 3 * H],
                  preferred_element_type=jnp.float32) + bqkv
    q, k, v = qkv[:, 0:H], qkv[:, H:2 * H], qkv[:, 2 * H:3 * H]

    # ---- streaming chunk mask, generated on-chip ----
    mask = _streaming_chunk_mask()                     # (S, S)

    # ---- per-head attention with out_proj folded into the loop (no concat) --
    acc = jnp.zeros((S, H), jnp.float32)
    for hh in range(NH):
        sl = slice(hh * HD, (hh + 1) * HD)
        qh, kh, vh = q[:, sl], k[:, sl], v[:, sl]
        s = lax.dot_general(qh, kh, (((1,), (1,)), ((), ())),
                            preferred_element_type=jnp.float32) + mask
        s = s - jnp.max(s, axis=-1, keepdims=True)
        p = jnp.exp(s)
        p = p * pl.reciprocal(jnp.sum(p, axis=-1, keepdims=True), approx=True)
        oh = jnp.dot(p, vh, preferred_element_type=jnp.float32)
        # fold out_proj: sublane slice of Wo (8-row aligned, 128-lane aligned)
        acc = acc + jnp.dot(oh, w_ref[hh * HD:(hh + 1) * HD, CW_O:CW_O + H],
                            preferred_element_type=jnp.float32)

    # dropout is identity in eval mode
    h1 = x + acc + bo                                  # attention residual

    # ---- feed forward ----
    h2 = _layer_norm(h1, ln2_g, ln2_b)
    ff = jnp.dot(h2, w_ref[0:H, CW_1:CW_1 + I],
                 preferred_element_type=jnp.float32) + b1
    ff = 0.5 * ff * (1.0 + lax.erf(ff * 0.7071067811865476))   # exact GELU
    ff = jnp.dot(ff, w_ref[0:I, CW_2:CW_2 + H],
                 preferred_element_type=jnp.float32) + b2

    out_ref[...] = (h1 + ff).astype(out_ref.dtype)


def make_chunk_mask(seq_len, chunk_size, left_context, right_context):
    """Host-side replica of _create_chunk_attention_mask (for the reference)."""
    mask = np.full((seq_len, seq_len), NEG_INF, np.float32)
    for i in range(seq_len):
        c = i // chunk_size
        cs = c * chunk_size
        ce = min((c + 1) * chunk_size, seq_len)
        ls = max(0, i - left_context)
        re = min(seq_len, i + right_context + 1)
        mask[i, cs:ce] = 0.0
        mask[i, ls:cs] = 0.0
        if re > ce:
            mask[i, ce:re] = 0.0
    return jnp.asarray(mask)


def pack_params(params):
    """Pack all weights/biases/LN params into two lane-aligned slabs."""
    scale = 1.0 / np.sqrt(HD)

    W = np.zeros((W_ROWS, W_COLS), np.float32)
    W[0:H, CW_QKV:CW_QKV + H] = np.asarray(params["wq"]) * scale
    W[0:H, CW_QKV + H:CW_QKV + 2 * H] = np.asarray(params["wk"])
    W[0:H, CW_QKV + 2 * H:CW_QKV + 3 * H] = np.asarray(params["wv"])
    W[0:H, CW_O:CW_O + H] = np.asarray(params["wo"])
    W[0:H, CW_1:CW_1 + I] = np.asarray(params["w1"])
    W[0:I, CW_2:CW_2 + H] = np.asarray(params["w2"])

    V = np.zeros((V_ROWS, 128), np.float32)
    V[R_BQKV, 0:H] = np.asarray(params["bq"])[0] * scale
    V[R_BQKV, H:2 * H] = np.asarray(params["bk"])[0]
    V[R_BQKV, 2 * H:3 * H] = np.asarray(params["bv"])[0]
    V[R_BO, 0:H] = np.asarray(params["bo"])[0]
    V[R_LN1G, 0:H] = np.asarray(params["ln1_g"])[0]
    V[R_LN1B, 0:H] = np.asarray(params["ln1_b"])[0]
    V[R_LN2G, 0:H] = np.asarray(params["ln2_g"])[0]
    V[R_LN2B, 0:H] = np.asarray(params["ln2_b"])[0]
    V[R_B1, 0:I] = np.asarray(params["b1"])[0]
    V[R_B2, 0:H] = np.asarray(params["b2"])[0]

    return jnp.asarray(W), jnp.asarray(V)


def streaming_encoder_layer(x, w_slab, v_slab):
    """x: (B, S, H) float32. Returns (B, S, H) float32."""
    x2d = x.reshape(B * S, H)                 # free wrapper-side flatten
    out2d = pl.pallas_call(
        encoder_layer_kernel,
        out_shape=jax.ShapeDtypeStruct((B * S, H), jnp.float32),
        grid=(B,),
        in_specs=[
            pl.BlockSpec((S, H), lambda b: (b, 0)),            # per-batch rows
            pl.BlockSpec((W_ROWS, W_COLS), lambda b: (0, 0)),  # resident weights
            pl.BlockSpec((V_ROWS, 128), lambda b: (0, 0)),     # resident vectors
        ],
        out_specs=pl.BlockSpec((S, H), lambda b: (b, 0)),
        compiler_params=pltpu.CompilerParams(
            dimension_semantics=("parallel",)),                # v7x megacore
    )(x2d, w_slab, v_slab)
    return out2d.reshape(B, S, H)


# ---- pure-JAX reference (same math, used to sanity-check the kernel) --------
def reference(x, mask, p):
    def ln(v, g, b):
        m = jnp.mean(v, axis=-1, keepdims=True)
        var = jnp.mean((v - m) ** 2, axis=-1, keepdims=True)
        return (v - m) / jnp.sqrt(var + EPS) * g + b

    h = ln(x, p["ln1_g"], p["ln1_b"])
    scale = HD ** -0.5
    q = (h @ p["wq"] + p["bq"]) * scale
    k = h @ p["wk"] + p["bk"]
    v = h @ p["wv"] + p["bv"]
    q = q.reshape(B, S, NH, HD).transpose(0, 2, 1, 3)
    k = k.reshape(B, S, NH, HD).transpose(0, 2, 1, 3)
    v = v.reshape(B, S, NH, HD).transpose(0, 2, 1, 3)
    s = jnp.einsum("bhqd,bhkd->bhqk", q, k) + mask[None, None]
    pw = jax.nn.softmax(s, axis=-1)
    o = jnp.einsum("bhqk,bhkd->bhqd", pw, v)
    o = o.transpose(0, 2, 1, 3).reshape(B, S, H)
    o = o @ p["wo"] + p["bo"]
    h1 = x + o
    h2 = ln(h1, p["ln2_g"], p["ln2_b"])
    ff = h2 @ p["w1"] + p["b1"]
    ff = 0.5 * ff * (1.0 + lax.erf(ff * 0.7071067811865476))
    ff = ff @ p["w2"] + p["b2"]
    return h1 + ff


def init_params(key):
    ks = jax.random.split(key, 12)
    n = lambda k, shp: (jax.random.normal(k, shp, jnp.float32) * 0.02)
    return {
        "ln1_g": jnp.ones((1, H), jnp.float32),
        "ln1_b": jnp.zeros((1, H), jnp.float32),
        "wq": n(ks[0], (H, H)), "bq": n(ks[1], (1, H)),
        "wk": n(ks[2], (H, H)), "bk": n(ks[3], (1, H)),
        "wv": n(ks[4], (H, H)), "bv": n(ks[5], (1, H)),
        "wo": n(ks[6], (H, H)), "bo": n(ks[7], (1, H)),
        "ln2_g": jnp.ones((1, H), jnp.float32),
        "ln2_b": jnp.zeros((1, H), jnp.float32),
        "w1": n(ks[8], (H, I)), "b1": n(ks[9], (1, I)),
        "w2": n(ks[10], (I, H)), "b2": n(ks[11], (1, H)),
    }


if __name__ == "__main__":
    root = jax.random.PRNGKey(0)
    k_x, k_p = jax.random.split(root)
    x = jax.random.normal(k_x, (B, S, H), jnp.float32)
    params = init_params(k_p)
    w_slab, v_slab = pack_params(params)

    out = jax.block_until_ready(streaming_encoder_layer(x, w_slab, v_slab))

    chunk_mask = make_chunk_mask(S, CHUNK_SIZE, LEFT_CONTEXT, RIGHT_CONTEXT)
    ref = jax.block_until_ready(reference(x, chunk_mask, params))

    assert out.shape == (B, S, H)
    np.testing.assert_allclose(np.asarray(out), np.asarray(ref),
                               rtol=1e-4, atol=1e-4)
    print("KERNEL_OK")
</pallas_src>

<mosaic_0001>
module attributes {stable_mosaic.version = 11 : i64} {
  func.func @encoder_layer_kernel(%arg0: i32, %arg1: memref<16x32xf32, #tpu.memory_space<vmem>>, %arg2: memref<64x512xf32, #tpu.memory_space<vmem>>, %arg3: memref<8x128xf32, #tpu.memory_space<vmem>>, %arg4: memref<16x32xf32, #tpu.memory_space<vmem>>) attributes {dimension_semantics = [#tpu.dimension_semantics<parallel>], iteration_bounds = array<i64: 2>, scalar_prefetch = 0 : i64, scratch_operands = 0 : i64, tpu.core_type = #tpu.core_type<tc>, window_params = [{transform_indices = @transform_0, window_bounds = array<i64: 16, 32>}, {pipeline_mode = #tpu.pipeline_mode<synchronous>, transform_indices = @transform_1, window_bounds = array<i64: 64, 512>}, {pipeline_mode = #tpu.pipeline_mode<synchronous>, transform_indices = @transform_2, window_bounds = array<i64: 8, 128>}, {transform_indices = @transform_3, window_bounds = array<i64: 16, 32>}]} {
    %c0 = arith.constant 0 : index
    %c0_0 = arith.constant 0 : index
    %0 = vector.load %arg1[%c0, %c0_0] : memref<16x32xf32, #tpu.memory_space<vmem>>, vector<16x32xf32>
    %c0_1 = arith.constant 0 : index
    %c0_2 = arith.constant 0 : index
    %1 = vector.load %arg3[%c0_1, %c0_2] : memref<8x128xf32, #tpu.memory_space<vmem>>, vector<1x96xf32>
    %c1 = arith.constant 1 : index
    %c0_3 = arith.constant 0 : index
    %2 = vector.load %arg3[%c1, %c0_3] : memref<8x128xf32, #tpu.memory_space<vmem>>, vector<1x32xf32>
    %c2 = arith.constant 2 : index
    %c0_4 = arith.constant 0 : index
    %3 = vector.load %arg3[%c2, %c0_4] : memref<8x128xf32, #tpu.memory_space<vmem>>, vector<1x32xf32>
    %c3 = arith.constant 3 : index
    %c0_5 = arith.constant 0 : index
    %4 = vector.load %arg3[%c3, %c0_5] : memref<8x128xf32, #tpu.memory_space<vmem>>, vector<1x32xf32>
    %c4 = arith.constant 4 : index
    %c0_6 = arith.constant 0 : index
    %5 = vector.load %arg3[%c4, %c0_6] : memref<8x128xf32, #tpu.memory_space<vmem>>, vector<1x32xf32>
    %c5 = arith.constant 5 : index
    %c0_7 = arith.constant 0 : index
    %6 = vector.load %arg3[%c5, %c0_7] : memref<8x128xf32, #tpu.memory_space<vmem>>, vector<1x32xf32>
    %c6 = arith.constant 6 : index
    %c0_8 = arith.constant 0 : index
    %7 = vector.load %arg3[%c6, %c0_8] : memref<8x128xf32, #tpu.memory_space<vmem>>, vector<1x64xf32>
    %c7 = arith.constant 7 : index
    %c0_9 = arith.constant 0 : index
    %8 = vector.load %arg3[%c7, %c0_9] : memref<8x128xf32, #tpu.memory_space<vmem>>, vector<1x32xf32>
    %cst = arith.constant dense<0.000000e+00> : vector<16xf32>
    %9 = vector.multi_reduction <add>, %0, %cst [1] : vector<16x32xf32> to vector<16xf32>
    %10 = vector.shape_cast %9 : vector<16xf32> to vector<16x1xf32>
    %cst_10 = arith.constant 3.200000e+01 : f32
    %11 = vector.broadcast %cst_10 : f32 to vector<16x1xf32>
    %12 = arith.divf %10, %11 : vector<16x1xf32>
    %13 = vector.broadcast %12 : vector<16x1xf32> to vector<16x32xf32>
    %14 = arith.subf %0, %13 : vector<16x32xf32>
    %15 = arith.mulf %14, %14 : vector<16x32xf32>
    %cst_11 = arith.constant dense<0.000000e+00> : vector<16xf32>
    %16 = vector.multi_reduction <add>, %15, %cst_11 [1] : vector<16x32xf32> to vector<16xf32>
    %17 = vector.shape_cast %16 : vector<16xf32> to vector<16x1xf32>
    %cst_12 = arith.constant 3.200000e+01 : f32
    %18 = vector.broadcast %cst_12 : f32 to vector<16x1xf32>
    %19 = arith.divf %17, %18 : vector<16x1xf32>
    %20 = vector.broadcast %12 : vector<16x1xf32> to vector<16x32xf32>
    %21 = arith.subf %0, %20 : vector<16x32xf32>
    %cst_13 = arith.constant 9.99999974E-6 : f32
    %22 = vector.broadcast %cst_13 : f32 to vector<16x1xf32>
    %23 = arith.addf %19, %22 : vector<16x1xf32>
    %24 = math.rsqrt %23 : vector<16x1xf32>
    %25 = vector.broadcast %24 : vector<16x1xf32> to vector<16x32xf32>
    %26 = arith.mulf %21, %25 : vector<16x32xf32>
    %27 = vector.broadcast %3 : vector<1x32xf32> to vector<16x32xf32>
    %28 = arith.mulf %26, %27 : vector<16x32xf32>
    %29 = vector.broadcast %4 : vector<1x32xf32> to vector<16x32xf32>
    %30 = arith.addf %28, %29 : vector<16x32xf32>
    %c0_14 = arith.constant 0 : index
    %c0_15 = arith.constant 0 : index
    %31 = vector.load %arg2[%c0_14, %c0_15] : memref<64x512xf32, #tpu.memory_space<vmem>>, vector<32x96xf32>
    %cst_16 = arith.constant dense<0.000000e+00> : vector<16x96xf32>
    %32 = tpu.matmul %30, %31, %cst_16 {dimension_numbers = #tpu.dot_dimension_numbers<[1], [0], [0], [1], [0, 0, 1, 1], [], []>} : vector<16x32xf32>, vector<32x96xf32>, vector<16x96xf32> -> vector<16x96xf32>
    %33 = vector.broadcast %1 : vector<1x96xf32> to vector<16x96xf32>
    %34 = arith.addf %32, %33 : vector<16x96xf32>
    %35 = vector.extract_strided_slice %34 {offsets = [0, 0], sizes = [16, 32], strides = [1, 1]} : vector<16x96xf32> to vector<16x32xf32>
    %36 = vector.extract_strided_slice %34 {offsets = [0, 32], sizes = [16, 32], strides = [1, 1]} : vector<16x96xf32> to vector<16x32xf32>
    %37 = vector.extract_strided_slice %34 {offsets = [0, 64], sizes = [16, 32], strides = [1, 1]} : vector<16x96xf32> to vector<16x32xf32>
    %38 = tpu.iota {dimensions = array<i32: 0>} : vector<16x16xi32>
    %39 = arith.sitofp %38 : vector<16x16xi32> to vector<16x16xf32>
    %40 = tpu.iota {dimensions = array<i32: 1>} : vector<16x16xi32>
    %41 = arith.sitofp %40 : vector<16x16xi32> to vector<16x16xf32>
    %cst_17 = arith.constant 1.000000e-01 : f32
    %42 = vector.broadcast %cst_17 : f32 to vector<16x16xf32>
    %43 = arith.mulf %39, %42 : vector<16x16xf32>
    %44 = math.floor %43 : vector<16x16xf32>
    %cst_18 = arith.constant 1.000000e+01 : f32
    %45 = vector.broadcast %cst_18 : f32 to vector<16x16xf32>
    %46 = arith.mulf %44, %45 : vector<16x16xf32>
    %cst_19 = arith.constant 1.000000e+01 : f32
    %47 = vector.broadcast %cst_19 : f32 to vector<16x16xf32>
    %48 = arith.addf %46, %47 : vector<16x16xf32>
    %cst_20 = arith.constant 1.600000e+01 : f32
    %49 = vector.broadcast %cst_20 : f32 to vector<16x16xf32>
    %50 = arith.minimumf %48, %49 : vector<16x16xf32>
    %cst_21 = arith.constant 2.500000e+01 : f32
    %51 = vector.broadcast %cst_21 : f32 to vector<16x16xf32>
    %52 = arith.subf %39, %51 : vector<16x16xf32>
    %53 = arith.minimumf %52, %46 : vector<16x16xf32>
    %cst_22 = arith.constant 1.000000e+00 : f32
    %54 = vector.broadcast %cst_22 : f32 to vector<16x16xf32>
    %55 = arith.addf %39, %54 : vector<16x16xf32>
    %56 = arith.cmpf oge, %41, %53 : vector<16x16xf32>
    %57 = arith.cmpf olt, %41, %50 : vector<16x16xf32>
    %58 = arith.andi %56, %57 : vector<16x16xi1>
    %59 = arith.cmpf oge, %41, %50 : vector<16x16xf32>
    %60 = arith.cmpf olt, %41, %55 : vector<16x16xf32>
    %61 = arith.andi %59, %60 : vector<16x16xi1>
    %62 = arith.ori %58, %61 : vector<16x16xi1>
    %cst_23 = arith.constant 0.000000e+00 : f32
    %cst_24 = arith.constant -1.000000e+09 : f32
    %63 = vector.broadcast %cst_23 : f32 to vector<16x16xf32>
    %64 = vector.broadcast %cst_24 : f32 to vector<16x16xf32>
    %65 = arith.select %62, %63, %64 : vector<16x16xi1>, vector<16x16xf32>
    %cst_25 = arith.constant 0.000000e+00 : f32
    %66 = vector.broadcast %cst_25 : f32 to vector<16x32xf32>
    %67 = vector.extract_strided_slice %35 {offsets = [0, 0], sizes = [16, 8], strides = [1, 1]} : vector<16x32xf32> to vector<16x8xf32>
    %68 = vector.extract_strided_slice %36 {offsets = [0, 0], sizes = [16, 8], strides = [1, 1]} : vector<16x32xf32> to vector<16x8xf32>
    %69 = vector.extract_strided_slice %37 {offsets = [0, 0], sizes = [16, 8], strides = [1, 1]} : vector<16x32xf32> to vector<16x8xf32>
    %cst_26 = arith.constant dense<0.000000e+00> : vector<16x16xf32>
    %70 = tpu.matmul %67, %68, %cst_26 {dimension_numbers = #tpu.dot_dimension_numbers<[1], [1], [0], [0], [0, 0, 1, 0], [], []>} : vector<16x8xf32>, vector<16x8xf32>, vector<16x16xf32> -> vector<16x16xf32>
    %71 = arith.addf %70, %65 : vector<16x16xf32>
    %cst_27 = arith.constant dense<0xFF800000> : vector<16xf32>
    %72 = vector.multi_reduction <maximumf>, %71, %cst_27 [1] : vector<16x16xf32> to vector<16xf32>
    %73 = vector.shape_cast %72 : vector<16xf32> to vector<16x1xf32>
    %74 = vector.broadcast %73 : vector<16x1xf32> to vector<16x16xf32>
    %75 = arith.subf %71, %74 : vector<16x16xf32>
    %76 = math.exp %75 : vector<16x16xf32>
    %cst_28 = arith.constant dense<0.000000e+00> : vector<16xf32>
    %77 = vector.multi_reduction <add>, %76, %cst_28 [1] : vector<16x16xf32> to vector<16xf32>
    %78 = vector.shape_cast %77 : vector<16xf32> to vector<16x1xf32>
    %79 = tpu.reciprocal %78 {approx = true} : vector<16x1xf32> -> vector<16x1xf32>
    %80 = vector.broadcast %79 : vector<16x1xf32> to vector<16x16xf32>
    %81 = arith.mulf %76, %80 : vector<16x16xf32>
    %cst_29 = arith.constant dense<0.000000e+00> : vector<16x8xf32>
    %82 = tpu.matmul %81, %69, %cst_29 {dimension_numbers = #tpu.dot_dimension_numbers<[1], [0], [0], [1], [0, 0, 1, 1], [], []>} : vector<16x16xf32>, vector<16x8xf32>, vector<16x8xf32> -> vector<16x8xf32>
    %c0_30 = arith.constant 0 : index
    %c128 = arith.constant 128 : index
    %83 = vector.load %arg2[%c0_30, %c128] : memref<64x512xf32, #tpu.memory_space<vmem>>, vector<8x32xf32>
    %cst_31 = arith.constant dense<0.000000e+00> : vector<16x32xf32>
    %84 = tpu.matmul %82, %83, %cst_31 {dimension_numbers = #tpu.dot_dimension_numbers<[1], [0], [0], [1], [0, 0, 1, 1], [], []>} : vector<16x8xf32>, vector<8x32xf32>, vector<16x32xf32> -> vector<16x32xf32>
    %85 = arith.addf %66, %84 : vector<16x32xf32>
    %86 = vector.extract_strided_slice %35 {offsets = [0, 8], sizes = [16, 8], strides = [1, 1]} : vector<16x32xf32> to vector<16x8xf32>
    %87 = vector.extract_strided_slice %36 {offsets = [0, 8], sizes = [16, 8], strides = [1, 1]} : vector<16x32xf32> to vector<16x8xf32>
    %88 = vector.extract_strided_slice %37 {offsets = [0, 8], sizes = [16, 8], strides = [1, 1]} : vector<16x32xf32> to vector<16x8xf32>
    %cst_32 = arith.constant dense<0.000000e+00> : vector<16x16xf32>
    %89 = tpu.matmul %86, %87, %cst_32 {dimension_numbers = #tpu.dot_dimension_numbers<[1], [1], [0], [0], [0, 0, 1, 0], [], []>} : vector<16x8xf32>, vector<16x8xf32>, vector<16x16xf32> -> vector<16x16xf32>
    %90 = arith.addf %89, %65 : vector<16x16xf32>
    %cst_33 = arith.constant dense<0xFF800000> : vector<16xf32>
    %91 = vector.multi_reduction <maximumf>, %90, %cst_33 [1] : vector<16x16xf32> to vector<16xf32>
    %92 = vector.shape_cast %91 : vector<16xf32> to vector<16x1xf32>
    %93 = vector.broadcast %92 : vector<16x1xf32> to vector<16x16xf32>
    %94 = arith.subf %90, %93 : vector<16x16xf32>
    %95 = math.exp %94 : vector<16x16xf32>
    %cst_34 = arith.constant dense<0.000000e+00> : vector<16xf32>
    %96 = vector.multi_reduction <add>, %95, %cst_34 [1] : vector<16x16xf32> to vector<16xf32>
    %97 = vector.shape_cast %96 : vector<16xf32> to vector<16x1xf32>
    %98 = tpu.reciprocal %97 {approx = true} : vector<16x1xf32> -> vector<16x1xf32>
    %99 = vector.broadcast %98 : vector<16x1xf32> to vector<16x16xf32>
    %100 = arith.mulf %95, %99 : vector<16x16xf32>
    %cst_35 = arith.constant dense<0.000000e+00> : vector<16x8xf32>
    %101 = tpu.matmul %100, %88, %cst_35 {dimension_numbers = #tpu.dot_dimension_numbers<[1], [0], [0], [1], [0, 0, 1, 1], [], []>} : vector<16x16xf32>, vector<16x8xf32>, vector<16x8xf32> -> vector<16x8xf32>
    %c8 = arith.constant 8 : index
    %c128_36 = arith.constant 128 : index
    %102 = vector.load %arg2[%c8, %c128_36] : memref<64x512xf32, #tpu.memory_space<vmem>>, vector<8x32xf32>
    %cst_37 = arith.constant dense<0.000000e+00> : vector<16x32xf32>
    %103 = tpu.matmul %101, %102, %cst_37 {dimension_numbers = #tpu.dot_dimension_numbers<[1], [0], [0], [1], [0, 0, 1, 1], [], []>} : vector<16x8xf32>, vector<8x32xf32>, vector<16x32xf32> -> vector<16x32xf32>
    %104 = arith.addf %85, %103 : vector<16x32xf32>
    %105 = vector.extract_strided_slice %35 {offsets = [0, 16], sizes = [16, 8], strides = [1, 1]} : vector<16x32xf32> to vector<16x8xf32>
    %106 = vector.extract_strided_slice %36 {offsets = [0, 16], sizes = [16, 8], strides = [1, 1]} : vector<16x32xf32> to vector<16x8xf32>
    %107 = vector.extract_strided_slice %37 {offsets = [0, 16], sizes = [16, 8], strides = [1, 1]} : vector<16x32xf32> to vector<16x8xf32>
    %cst_38 = arith.constant dense<0.000000e+00> : vector<16x16xf32>
    %108 = tpu.matmul %105, %106, %cst_38 {dimension_numbers = #tpu.dot_dimension_numbers<[1], [1], [0], [0], [0, 0, 1, 0], [], []>} : vector<16x8xf32>, vector<16x8xf32>, vector<16x16xf32> -> vector<16x16xf32>
    %109 = arith.addf %108, %65 : vector<16x16xf32>
    %cst_39 = arith.constant dense<0xFF800000> : vector<16xf32>
    %110 = vector.multi_reduction <maximumf>, %109, %cst_39 [1] : vector<16x16xf32> to vector<16xf32>
    %111 = vector.shape_cast %110 : vector<16xf32> to vector<16x1xf32>
    %112 = vector.broadcast %111 : vector<16x1xf32> to vector<16x16xf32>
    %113 = arith.subf %109, %112 : vector<16x16xf32>
    %114 = math.exp %113 : vector<16x16xf32>
    %cst_40 = arith.constant dense<0.000000e+00> : vector<16xf32>
    %115 = vector.multi_reduction <add>, %114, %cst_40 [1] : vector<16x16xf32> to vector<16xf32>
    %116 = vector.shape_cast %115 : vector<16xf32> to vector<16x1xf32>
    %117 = tpu.reciprocal %116 {approx = true} : vector<16x1xf32> -> vector<16x1xf32>
    %118 = vector.broadcast %117 : vector<16x1xf32> to vector<16x16xf32>
    %119 = arith.mulf %114, %118 : vector<16x16xf32>
    %cst_41 = arith.constant dense<0.000000e+00> : vector<16x8xf32>
    %120 = tpu.matmul %119, %107, %cst_41 {dimension_numbers = #tpu.dot_dimension_numbers<[1], [0], [0], [1], [0, 0, 1, 1], [], []>} : vector<16x16xf32>, vector<16x8xf32>, vector<16x8xf32> -> vector<16x8xf32>
    %c16 = arith.constant 16 : index
    %c128_42 = arith.constant 128 : index
    %121 = vector.load %arg2[%c16, %c128_42] : memref<64x512xf32, #tpu.memory_space<vmem>>, vector<8x32xf32>
    %cst_43 = arith.constant dense<0.000000e+00> : vector<16x32xf32>
    %122 = tpu.matmul %120, %121, %cst_43 {dimension_numbers = #tpu.dot_dimension_numbers<[1], [0], [0], [1], [0, 0, 1, 1], [], []>} : vector<16x8xf32>, vector<8x32xf32>, vector<16x32xf32> -> vector<16x32xf32>
    %123 = arith.addf %104, %122 : vector<16x32xf32>
    %124 = vector.extract_strided_slice %35 {offsets = [0, 24], sizes = [16, 8], strides = [1, 1]} : vector<16x32xf32> to vector<16x8xf32>
    %125 = vector.extract_strided_slice %36 {offsets = [0, 24], sizes = [16, 8], strides = [1, 1]} : vector<16x32xf32> to vector<16x8xf32>
    %126 = vector.extract_strided_slice %37 {offsets = [0, 24], sizes = [16, 8], strides = [1, 1]} : vector<16x32xf32> to vector<16x8xf32>
    %cst_44 = arith.constant dense<0.000000e+00> : vector<16x16xf32>
    %127 = tpu.matmul %124, %125, %cst_44 {dimension_numbers = #tpu.dot_dimension_numbers<[1], [1], [0], [0], [0, 0, 1, 0], [], []>} : vector<16x8xf32>, vector<16x8xf32>, vector<16x16xf32> -> vector<16x16xf32>
    %128 = arith.addf %127, %65 : vector<16x16xf32>
    %cst_45 = arith.constant dense<0xFF800000> : vector<16xf32>
    %129 = vector.multi_reduction <maximumf>, %128, %cst_45 [1] : vector<16x16xf32> to vector<16xf32>
    %130 = vector.shape_cast %129 : vector<16xf32> to vector<16x1xf32>
    %131 = vector.broadcast %130 : vector<16x1xf32> to vector<16x16xf32>
    %132 = arith.subf %128, %131 : vector<16x16xf32>
    %133 = math.exp %132 : vector<16x16xf32>
    %cst_46 = arith.constant dense<0.000000e+00> : vector<16xf32>
    %134 = vector.multi_reduction <add>, %133, %cst_46 [1] : vector<16x16xf32> to vector<16xf32>
    %135 = vector.shape_cast %134 : vector<16xf32> to vector<16x1xf32>
    %136 = tpu.reciprocal %135 {approx = true} : vector<16x1xf32> -> vector<16x1xf32>
    %137 = vector.broadcast %136 : vector<16x1xf32> to vector<16x16xf32>
    %138 = arith.mulf %133, %137 : vector<16x16xf32>
    %cst_47 = arith.constant dense<0.000000e+00> : vector<16x8xf32>
    %139 = tpu.matmul %138, %126, %cst_47 {dimension_numbers = #tpu.dot_dimension_numbers<[1], [0], [0], [1], [0, 0, 1, 1], [], []>} : vector<16x16xf32>, vector<16x8xf32>, vector<16x8xf32> -> vector<16x8xf32>
    %c24 = arith.constant 24 : index
    %c128_48 = arith.constant 128 : index
    %140 = vector.load %arg2[%c24, %c128_48] : memref<64x512xf32, #tpu.memory_space<vmem>>, vector<8x32xf32>
    %cst_49 = arith.constant dense<0.000000e+00> : vector<16x32xf32>
    %141 = tpu.matmul %139, %140, %cst_49 {dimension_numbers = #tpu.dot_dimension_numbers<[1], [0], [0], [1], [0, 0, 1, 1], [], []>} : vector<16x8xf32>, vector<8x32xf32>, vector<16x32xf32> -> vector<16x32xf32>
    %142 = arith.addf %123, %141 : vector<16x32xf32>
    %143 = arith.addf %0, %142 : vector<16x32xf32>
    %144 = vector.broadcast %2 : vector<1x32xf32> to vector<16x32xf32>
    %145 = arith.addf %143, %144 : vector<16x32xf32>
    %cst_50 = arith.constant dense<0.000000e+00> : vector<16xf32>
    %146 = vector.multi_reduction <add>, %145, %cst_50 [1] : vector<16x32xf32> to vector<16xf32>
    %147 = vector.shape_cast %146 : vector<16xf32> to vector<16x1xf32>
    %cst_51 = arith.constant 3.200000e+01 : f32
    %148 = vector.broadcast %cst_51 : f32 to vector<16x1xf32>
    %149 = arith.divf %147, %148 : vector<16x1xf32>
    %150 = vector.broadcast %149 : vector<16x1xf32> to vector<16x32xf32>
    %151 = arith.subf %145, %150 : vector<16x32xf32>
    %152 = arith.mulf %151, %151 : vector<16x32xf32>
    %cst_52 = arith.constant dense<0.000000e+00> : vector<16xf32>
    %153 = vector.multi_reduction <add>, %152, %cst_52 [1] : vector<16x32xf32> to vector<16xf32>
    %154 = vector.shape_cast %153 : vector<16xf32> to vector<16x1xf32>
    %cst_53 = arith.constant 3.200000e+01 : f32
    %155 = vector.broadcast %cst_53 : f32 to vector<16x1xf32>
    %156 = arith.divf %154, %155 : vector<16x1xf32>
    %157 = vector.broadcast %149 : vector<16x1xf32> to vector<16x32xf32>
    %158 = arith.subf %145, %157 : vector<16x32xf32>
    %cst_54 = arith.constant 9.99999974E-6 : f32
    %159 = vector.broadcast %cst_54 : f32 to vector<16x1xf32>
    %160 = arith.addf %156, %159 : vector<16x1xf32>
    %161 = math.rsqrt %160 : vector<16x1xf32>
    %162 = vector.broadcast %161 : vector<16x1xf32> to vector<16x32xf32>
    %163 = arith.mulf %158, %162 : vector<16x32xf32>
    %164 = vector.broadcast %5 : vector<1x32xf32> to vector<16x32xf32>
    %165 = arith.mulf %163, %164 : vector<16x32xf32>
    %166 = vector.broadcast %6 : vector<1x32xf32> to vector<16x32xf32>
    %167 = arith.addf %165, %166 : vector<16x32xf32>
    %c0_55 = arith.constant 0 : index
    %c256 = arith.constant 256 : index
    %168 = vector.load %arg2[%c0_55, %c256] : memref<64x512xf32, #tpu.memory_space<vmem>>, vector<32x64xf32>
    %cst_56 = arith.constant dense<0.000000e+00> : vector<16x64xf32>
    %169 = tpu.matmul %167, %168, %cst_56 {dimension_numbers = #tpu.dot_dimension_numbers<[1], [0], [0], [1], [0, 0, 1, 1], [], []>} : vector<16x32xf32>, vector<32x64xf32>, vector<16x64xf32> -> vector<16x64xf32>
    %170 = vector.broadcast %7 : vector<1x64xf32> to vector<16x64xf32>
    %171 = arith.addf %169, %170 : vector<16x64xf32>
    %cst_57 = arith.constant 5.000000e-01 : f32
    %172 = vector.broadcast %cst_57 : f32 to vector<16x64xf32>
    %173 = arith.mulf %172, %171 : vector<16x64xf32>
    %cst_58 = arith.constant 0.707106769 : f32
    %174 = vector.broadcast %cst_58 : f32 to vector<16x64xf32>
    %175 = arith.mulf %171, %174 : vector<16x64xf32>
    %176 = math.erf %175 : vector<16x64xf32>
    %cst_59 = arith.constant 1.000000e+00 : f32
    %177 = vector.broadcast %cst_59 : f32 to vector<16x64xf32>
    %178 = arith.addf %177, %176 : vector<16x64xf32>
    %179 = arith.mulf %173, %178 : vector<16x64xf32>
    %c0_60 = arith.constant 0 : index
    %c384 = arith.constant 384 : index
    %180 = vector.load %arg2[%c0_60, %c384] : memref<64x512xf32, #tpu.memory_space<vmem>>, vector<64x32xf32>
    %cst_61 = arith.constant dense<0.000000e+00> : vector<16x32xf32>
    %181 = tpu.matmul %179, %180, %cst_61 {dimension_numbers = #tpu.dot_dimension_numbers<[1], [0], [0], [1], [0, 0, 1, 1], [], []>} : vector<16x64xf32>, vector<64x32xf32>, vector<16x32xf32> -> vector<16x32xf32>
    %182 = vector.broadcast %8 : vector<1x32xf32> to vector<16x32xf32>
    %183 = arith.addf %181, %182 : vector<16x32xf32>
    %184 = arith.addf %145, %183 : vector<16x32xf32>
    %c0_62 = arith.constant 0 : index
    %c0_63 = arith.constant 0 : index
    %185 = vector.load %arg4[%c0_62, %c0_63] : memref<16x32xf32, #tpu.memory_space<vmem>>, vector<16x32xf32>
    tpu.vector_store %arg4[%c0_62, %c0_63], %184 {strides = array<i32>} : memref<16x32xf32, #tpu.memory_space<vmem>>, vector<16x32xf32>,
    return
  }
  func.func @transform_0(%arg0: i32) -> (i32, i32) {
    %c0_i32 = arith.constant 0 : i32
    %c0_i32_0 = arith.constant 0 : i32
    return %arg0, %c0_i32 : i32, i32
  }
  func.func @transform_1(%arg0: i32) -> (i32, i32) {
    %c0_i32 = arith.constant 0 : i32
    %c0_i32_0 = arith.constant 0 : i32
    %c0_i32_1 = arith.constant 0 : i32
    return %c0_i32, %c0_i32_0 : i32, i32
  }
  func.func @transform_2(%arg0: i32) -> (i32, i32) {
    %c0_i32 = arith.constant 0 : i32
    %c0_i32_0 = arith.constant 0 : i32
    %c0_i32_1 = arith.constant 0 : i32
    return %c0_i32, %c0_i32_0 : i32, i32
  }
  func.func @transform_3(%arg0: i32) -> (i32, i32) {
    %c0_i32 = arith.constant 0 : i32
    %c0_i32_0 = arith.constant 0 : i32
    return %arg0, %c0_i32 : i32, i32
  }
}

</mosaic_0001>

<bundles_post_ra>
// kernel: tpu_custom_call.1
= control target key start
LH: loop header
LB: loop body
LE: loop exit
PB: predicated region body
PF: predicated region fallthrough
CT: control target
= control target key end

     0   :  { %8 = vsyncpa [#allocation3], 0  ;;  %s2946_s0 = inlined_call_operand.hbm [shape: f32[32,32], index: 0, kind: input, shape index: {}]   ;;  %s2947_s1 = inlined_call_operand.hbm [shape: f32[64,512], index: 1, kind: input, shape index: {}]   ;;  %s2948_s2 = inlined_call_operand.hbm [shape: f32[8,128], index: 2, kind: input, shape index: {}]   ;;  %s2949_s3 = inlined_call_operand.hbm [shape: f32[32,32], index: 3, kind: output, shape index: {}]  }
   0x1   :  { %10 = vsyncpa [#allocation3 + $0x1], 0 }
   0x2   :  { %11 = vsyncpa [#allocation6], 0 }
   0x3   :  { %12 = vsyncpa [#allocation4], 0 }
   0x4   :  { %14 = vsyncpa [#allocation4 + $0x1], 0  ;;  %s2576_s12 = smov 0   ;;  %s2578_s13 = smov 0  }
   0x5   :  { %s2580_s14 = smov 0   ;;  %s2582_s15 = smov 0  }
   0x6 LB: > { %s2597_s16 = sadd.s32 4294967295, %s2532_s15   ;;  %s1878_s17 = sadd.s32 4294967294, %s2532_s15   ;;  %s2532_s15 = sphi %s2582_s15, %s2991_s15   ;;  %s2528_s14 = sphi %s2580_s14, %s2990_s14   ;;  %s2524_s13 = sphi %s2578_s13, %s2989_s13   ;;  %s2520_s12 = sphi %s2576_s12, %s2988_s12  }
   0x7   : > { %p40_p0 = scmp.ne.s32.totalorder %s2524_s13, %s2520_s12  ;;  %p2950_p1 = scmp.eq.s32.totalorder %s2597_s16, 0 }
   0x8   : > { %p112_p3 = scmp.eq.s32.totalorder %s1878_s17, 1  ;;  %p1879_p5 = scmp.ge.s32.totalorder %s2532_s15, 1 }
   0x9   : > { %p2606_p4 = por %p2950_p1, %p40_p0  ;;  %p119_p7 = scmp.lt.s32.totalorder %s2532_s15, 3 }
   0xa   : > { %p2611_p6 = por %p112_p3, %p40_p0  ;;  %s2534_s21 = smov [#allocation5]  }
   0xb   : > { %s2955_s18 = scalar_select %p2606_p4, 1, 0 }
   0xc   : > { %s2956_s19 = scalar_select %p2611_p6, 1, 0 }
   0xd   : > { %p2616_p8 = pnand %p1879_p5, %p119_p7  ;;  %s131_s22 = sshll.u32 %s2534_s21, 4  ;;  %s2620_s22 = int_to_ptr.vmem [resolvable:$true] %s131_s22 }
   0xe   : > { %s2535_s24 = smov [#allocation7]   ;;  %s2376_s28 = scalar_lea.hbm %s2947_s1, 4096 }
   0xf   : > { %p2219_p9 = pneg %p2616_p8  ;;  %s145_s25 = sshll.u32 %s2535_s24, 4  ;;  %s2631_s25 = int_to_ptr.vmem [resolvable:$true] %s145_s25 }
  0x10   : > { %p2377_p12 = scmp.ne.s32.totalorder %s2947_s1, %s2376_s28  ;;  %p2383_p5 = scmp.lt.u32.totalorder %s2376_s28, %s2947_s1 }
  0x11   : > { %p2627_p11 = pnand %p2219_p9, %p2950_p1 }
  0x13   : > { %p2378_p13 = pneg %p2627_p11 }
  0x15   : > { %p2379_p0 = pnand %p2378_p13, %p2377_p12 }
  0x17   : > { %p2380_p3 = pneg %p2379_p0 }
  0x19   : > { %p2385_p7 = pnand %p2383_p5, %p2380_p3 }
  0x1b   : > { %2388 = shalt.err (!%p2385_p7)
}
  0x1c   : > { %s2389_s6 = scalar_lea.vmem %s2620_s22, 4096  ;;  %p2397_p2 = scmp.lt.s32.totalorder %s2620_s22, %s2620_s22 }
  0x1d   : > { %p2390_p9 = scmp.ne.s32.totalorder %s2620_s22, %s2389_s6  ;;  %p2398_p12 = scmp.lt.s32.totalorder %s2389_s6, %s2389_s6 }
  0x1f   : > { %p2392_p10 = pnand %p2390_p9, %p2378_p13  ;;  %p2399_p0 = por %p2398_p12, %p2397_p2 }
  0x21   : > { %p2393_p1 = pneg %p2392_p10 }
  0x23   : > { %p2400_p6 = pnand %p2399_p0, %p2393_p1 }
  0x25   : > { %2403 = shalt.err (!%p2400_p6)
}
  0x26   : > { %s2536_s7 = smov 512   ;;  %s2537_s8 = smov 32  }
  0x27   : > { %2222 = dma.hbm_to_vmem [thread:$0]  (!%p2627_p11), %s2947_s1, 4096, %s2620_s22, [#allocation6], %s2536_s7, %s2536_s7, %s2537_s8  }
  0x28   : > { %s2404_s21 = scalar_lea.hbm %s2948_s2, 128 }
  0x29   : > { %p2405_p2 = scmp.ne.s32.totalorder %s2948_s2, %s2404_s21  ;;  %p2411_p10 = scmp.lt.u32.totalorder %s2404_s21, %s2948_s2 }
  0x2b   : > { %p2407_p1 = pnand %p2405_p2, %p2378_p13 }
  0x2d   : > { %p2408_p6 = pneg %p2407_p1 }
  0x2f   : > { %p2413_p3 = pnand %p2411_p10, %p2408_p6 }
  0x31   : > { %2416 = shalt.err (!%p2413_p3)
}
  0x32   : > { %s2417_s22 = scalar_lea.vmem %s2631_s25, 128  ;;  %p2425_p12 = scmp.lt.s32.totalorder %s2631_s25, %s2631_s25 }
  0x33   : > { %p2418_p5 = scmp.ne.s32.totalorder %s2631_s25, %s2417_s22  ;;  %p2426_p0 = scmp.lt.s32.totalorder %s2417_s22, %s2417_s22 }
  0x35   : > { %p2420_p7 = pnand %p2418_p5, %p2378_p13  ;;  %p2427_p2 = por %p2426_p0, %p2425_p12 }
  0x37   : > { %p2421_p9 = pneg %p2420_p7 }
  0x39   : > { %p2428_p1 = pnand %p2427_p2, %p2421_p9 }
  0x3b   : > { %2431 = shalt.err (!%p2428_p1)
}
  0x3c   : > { %2225 = dma.hbm_to_vmem [thread:$0]  (!%p2627_p11), %s2948_s2, 128, %s2631_s25, [#allocation6]  }
  0x3d   : > { %s2686_s4 = sadd.s32 1, %s2532_s15   ;;  %s27_s23 = sadd.s32 1, %s2528_s14 }
  0x3e   : > { %s24_s5 = ssub.s32 %s2532_s15, %s2686_s4  ;;  %p34_p13 = scmp.ne.s32.totalorder %s2528_s14, %s2524_s13 }
  0x3f   : > { %p25_p6 = scmp.eq.s32.totalorder %s24_s5, 0  ;;  %p35_p10 = scmp.eq.s32.totalorder %s2532_s15, 0 }
  0x40   : > { %p2959_p3 = scmp.eq.s32.totalorder %s2597_s16, 1  ;;  %p2236_p7 = scmp.lt.s32.totalorder %s2532_s15, 2 }
  0x41   : > { %s2702_s7 = scalar_select %p25_p6, %s2528_s14, %s27_s23  }
  0x42   : > { %p2696_p5 = por %p2959_p3, %p34_p13  ;;  %p36_p9 = por %p35_p10, %p34_p13 }
  0x43   : > { %s156_s8 = sand.u32 1, %s2528_s14   ;;  %s1944_s25 = sshll.u32 %s2532_s15, 8 }
  0x44   : > { %s2960_s6 = scalar_select %p2696_p5, 1, 0 }
  0x45   : > { %s1883_s9 = sshll.u32 %s156_s8, 4  ;;  %s2709_s17 = scalar_lea.hbm %s2946_s0, %s1944_s25 }
  0x46   : > { %s160_s21 = scalar_lea.vmem [#allocation2], %s1883_s9  ;;  %p2713_p11 = pnand %p2236_p7, %p36_p9 }
  0x47   : > { %s167_s24 = sshll.u32 %s160_s21, 4  ;;  %s2717_s27 = scalar_lea.sflag [#allocation3], %s156_s8  ;;  %s2711_s24 = int_to_ptr.vmem [resolvable:$true] %s167_s24 }
  0x48   : > { %s2432_s28 = scalar_lea.hbm %s2709_s17, 256  ;;  %p2434_p0 = pneg %p2713_p11 }
  0x49   : > { %p2433_p12 = scmp.ne.s32.totalorder %s2709_s17, %s2432_s28  ;;  %s2437_s30 = scalar_lea.hbm %s2946_s0, 512 }
  0x4a   : > { %p2438_p13 = scmp.lt.u32.totalorder %s2709_s17, %s2946_s0  ;;  %p2439_p6 = scmp.lt.u32.totalorder %s2437_s30, %s2432_s28 }
  0x4b   : > { %p2435_p2 = pnand %p2434_p0, %p2433_p12  ;;  %p2441_p3 = scmp.lt.u32.totalorder %s2432_s28, %s2709_s17 }
  0x4c   : > { %p2440_p10 = por %p2439_p6, %p2438_p13 }
  0x4d   : > { %p2436_p1 = pneg %p2435_p2 }
  0x4e   : > { %p2442_p7 = por %p2441_p3, %p2440_p10 }
  0x50   : > { %p2443_p9 = pnand %p2442_p7, %p2436_p1 }
  0x52   : > { %2446 = shalt.err (!%p2443_p9)
}
  0x53   : > { %s2447_s8 = scalar_lea.vmem %s2711_s24, 256  ;;  %s2538_s9 = smov [#allocation2]  }
  0x54   : > { %p2448_p12 = scmp.ne.s32.totalorder %s2711_s24, %s2447_s8  ;;  %s2452_s25 = sshll.u32 %s2538_s9, 4  ;;  %s2453_s25 = int_to_ptr.vmem [resolvable:$false] %s2452_s25 }
  0x55   : > { %s2454_s10 = scalar_lea.vmem %s2453_s25, 512  ;;  %p2455_p4 = scmp.lt.s32.totalorder %s2711_s24, %s2453_s25 }
  0x56   : > { %p2450_p2 = pnand %p2448_p12, %p2434_p0  ;;  %p2456_p13 = scmp.lt.s32.totalorder %s2454_s10, %s2447_s8 }
  0x58   : > { %p2451_p5 = pneg %p2450_p2  ;;  %p2457_p6 = por %p2456_p13, %p2455_p4 }
  0x5a   : > { %p2458_p10 = pnand %p2457_p6, %p2451_p5 }
  0x5c   : > { %2461 = shalt.err (!%p2458_p10)
}
  0x5d   : > { %s2539_s11 = smov 128   ;;  %s2540_s21 = smov 8  }
  0x5e   : > { %2229 = dma.hbm_to_vmem [thread:$0]  (!%p2713_p11), %s2709_s17, 256, %s2711_s24, %s2717_s27, %s2539_s11, %s2539_s11, %s2540_s21  }
  0x5f   : > { %179 = sbr.rel (%p2616_p8) target bundleno = 3065 (0xbf9), region = 32  ;;  %s2748_s28 = sand.u32 (!%p2616_p8), 1, %s2524_s13  }
  0x60   : > { %s1887_s22 = sshll.u32 (!%p2616_p8), %s2748_s28, 4  ;;  %s182_s29 = scalar_lea.sflag (!%p2616_p8), [#allocation3], %s2748_s28 }
  0x61   : > { %s185_s30 = scalar_lea.vmem (!%p2616_p8), [#allocation2], %s1887_s22  ;;  %p2962_p4 = scmp.ne.s32.totalorder (!%p2616_p8), %s2955_s18, 0 }
  0x66   : > { %2507 = dma.done.wait (%p2962_p4), %s182_s29, 256  }
  0x67   : > { %2509 = vsyncadd (%p2962_p4), %s182_s29, 4294967040  ;;  %p2963_p5 = scmp.eq.s32.totalorder %s2597_s16, 0 }
  0x69   : > { %2511 = dma.done.wait (%p2963_p5), [#allocation6], 4224   ;;  %p2964_p8 = pmov %p2963_p5 }
  0x6a   : > { %vm2953_vm0 = vcmask 261120   ;;  %v2762_v0 = vld [vmem:[%s185_s30] sm:$0xff]  ;;  %v2764_v1 = vld [vmem:[%s185_s30 + $0x8] sm:$0xff]  ;;  %vm2954_vm1 = vcmask 64512   ;;  %s2541_s18 = smov 88   ;;  %s2542_s20 = smov 96   ;;  %v357_v59 = vlaneseq }
  0x6b   : > { %2513 = vsyncadd (%p2964_p8), [#allocation6], 4294963072  ;;  %v229_v2 = vsel %vm2953_vm0, %v2762_v0, 0.0  ;;  %v232_v3 = vsel %vm2953_vm0, %v2764_v1, 0.0  ;;  %v268_v14 = vld [vmem:[#allocation5] sm:$0xff]  ;;  %s2543_s17 = smov 120  }
  0x6c   : > { %230 = vadd.xlane.f32.xlu0 %v229_v2  ;;  %v269_v15 = vld [vmem:[#allocation5 + $0x20] sm:$0xff]  ;;  %s2544_s24 = smov 80   ;;  %s2545_s26 = smov 112   ;;  %vm2795_vm2 = vmpackc.low %vm2954_vm1, %vm2954_vm1  ;;  %v358_v60 = vshrl.u32 %v357_v59, 7 }
  0x6d   : > { %v270_v16 = vld [vmem:[#allocation5 + $0x40] sm:$0xff]  ;;  %v2129_v17 = vpack.c.bf16 %v269_v15, %v268_v14  ;;  %s2547_s27 = smov 64   ;;  %s2548_s23 = smov 72  }
  0x6e   : > { %v271_v18 = vld [vmem:[#allocation5 + $0x60] sm:$0xff]  ;;  %v359_v61 = vadd.s32 8, %v358_v60  ;;  %v360_v63 = vcvt.s32.f32 %v358_v60  ;;  %s2549_s5 = smov 104   ;;  %s2550_s8 = smov 56  }
  0x6f   : > { %v2133_v19 = vpack.c.bf16 %v271_v18, %v270_v16  ;;  %2130 = vmatprep.subr.bf16.mxu1 %v2129_v17  ;;  %v1891_v27 = vld [vmem:[#allocation7 + $0x2] ss:$0 sm:$0xff]  ;;  %v1892_v29 = vld [vmem:[#allocation7 + $0x3] ss:$0 sm:$0xff]  ;;  %v1893_v36 = vld [vmem:[#allocation7] ss:$0 sm:$0xff] }
  0x70   : > { %233 = vadd.xlane.f32.xlu0 %v232_v3  ;;  %2132 = vmatpush3.bf16.msra.mxu1 %v2129_v17  ;;  %v361_v62 = vcvt.s32.f32 %v359_v61  ;;  %v365_v3 = vmul.f32 0.1, %v360_v63  ;;  %s2551_s9 = smov 48   ;;  %s2552_s25 = smov 40  }
  0x71   : > { %2134 = vmatprep.subr.bf16.mxu1 %v2133_v19  ;;  %s1945_s10 = sshll.u32 %s2597_s16, 8  ;;  %s215_s11 = scalar_lea.vmem [#allocation8], %s1887_s22 }
  0x72   : > { %v366_v2 = vmul.f32 0.1, %v361_v62  ;;  %v380_v16 = vadd.f32 1.0, %v361_v62  ;;  %s1786_s21 = sshll.u32 %s215_s11, 4  ;;  %s1773_s16 = scalar_lea.sflag [#allocation4], %s2748_s28  ;;  %s2899_s21 = int_to_ptr.vmem [resolvable:$true] %s1786_s21 }
  0x73   : > { %s2462_s22 = scalar_lea.vmem %s2899_s21, 256  ;;  %p2985_p0 = scmp.ne.s32.totalorder %s2960_s6, 0 }
  0x74   : > { %2136 = vmatpush3.bf16.msra.mxu1 %v2133_v19  ;;  %v379_v19 = vadd.f32 1.0, %v360_v63  ;;  %p2463_p11 = scmp.ne.s32.totalorder %s2899_s21, %s2462_s22 }
  0x76   : > { %p2464_p1 = pnand %p2463_p11, %p2985_p0 }
  0x78   : > { %p2465_p3 = pneg %p2464_p1 }
  0xf9   : > { %v231_v4 = vpop.xlane.xlu0 %230 }
  0xfa   : > { %v236_v5 = vmul.f32 0.03125, %v231_v4  ;;  %v368_v4 = vfloor.f32 %v366_v2 }
  0xfc   : > { %v238_v6 = vsub.f32 %v2762_v0, %v236_v5  ;;  %v367_v5 = vfloor.f32 %v365_v3 }
  0xfd   : > { %v234_v7 = vpop.xlane.xlu0 %233 }
  0xfe   : > { %v237_v8 = vmul.f32 0.03125, %v234_v7  ;;  %v240_v9 = vmul.f32 %v238_v6, %v238_v6  ;;  %v369_v7 = vmul.f32 10.0, %v367_v5 }
 0x100   : > { %v239_v10 = vsub.f32 %v2764_v1, %v237_v8  ;;  %v242_v11 = vsel %vm2953_vm0, %v240_v9, 0.0  ;;  %v363_v8 = vand.u32 127, %v357_v59 }
 0x101   : > { %243 = vadd.xlane.f32.xlu1 %v242_v11  ;;  %v371_v11 = vadd.f32 10.0, %v369_v7 }
 0x102   : > { %v241_v12 = vmul.f32 %v239_v10, %v239_v10 }
 0x103   : > { %v373_v17 = vmin.f32 %v371_v11, 16.0 }
 0x104   : > { %v245_v13 = vsel %vm2953_vm0, %v241_v12, 0.0  ;;  %v1896_v12 = vadd.f32 -25.0, %v360_v63 }
 0x105   : > { %246 = vadd.xlane.f32.xlu1 %v245_v13  ;;  %v364_v13 = vcvt.s32.f32 %v363_v8 }
 0x106   : > { %v377_v18 = vmin.f32 %v1896_v12, %v369_v7 }
 0x107   : > { %vm390_vm6 = vcmp.lt.f32.partialorder %v364_v13, %v380_v16  ;;  %vm383_vm8 = vcmp.lt.f32.partialorder %v364_v13, %v373_v17  ;;  %vm387_vm10 = vcmp.ge.f32.partialorder %v364_v13, %v373_v17  ;;  %vm389_vm11 = vcmp.lt.f32.partialorder %v364_v13, %v379_v19 }
 0x108   : > { %vm381_vm7 = vcmp.ge.f32.partialorder %v364_v13, %v377_v18  ;;  %vm391_vm14 = vmand %vm387_vm10, %vm389_vm11 }
 0x109   : > { %vm385_vm13 = vmand %vm381_vm7, %vm383_vm8 }
 0x18e   : > { %v244_v20 = vpop.xlane.xlu1 %243 }
 0x18f   : > { %v248_v21 = vmul.f32 0.03125, %v244_v20  ;;  %v2546_v20 = vmov -1e+09  }
 0x191   : > { %v250_v22 = vadd.f32 1e-05, %v248_v21 }
 0x192   : > { %v247_v23 = vpop.xlane.xlu1 %246 }
 0x193   : > { %2332 = vrsqrt.f32 %v250_v22  ;;  %v249_v24 = vmul.f32 0.03125, %v247_v23 }
 0x195   : > { %v251_v25 = vadd.f32 1e-05, %v249_v24 }
 0x197   : > { %2334 = vrsqrt.f32 %v251_v25 }
 0x19d   : > { %v2333_v26 = vpop.eup %2332 }
 0x19e   : > { %v254_v28 = vmul.f32 %v2333_v26, %v238_v6  ;;  %v370_v6 = vmul.f32 10.0, %v368_v4 }
 0x1a0   : > { %v260_v30 = vmul.f32 %v1891_v27, %v254_v28  ;;  %v372_v9 = vadd.f32 10.0, %v370_v6 }
 0x1a1   : > { %v2335_v31 = vpop.eup %2334 }
 0x1a2   : > { %v255_v32 = vmul.f32 %v2335_v31, %v239_v10  ;;  %v266_v33 = vadd.f32 %v1892_v29, %v260_v30  ;;  %v1897_v10 = vadd.f32 -25.0, %v361_v62  ;;  %v374_v14 = vmin.f32 %v372_v9, 16.0 }
 0x1a4   : > { %v261_v34 = vmul.f32 %v1891_v27, %v255_v32  ;;  %2020 = vmatprep.mubr.msk.f32.mxu1 %vm2953_vm0, %v266_v33  ;;  %v378_v15 = vmin.f32 %v1897_v10, %v370_v6  ;;  %vm384_vm4 = vcmp.lt.f32.partialorder %v364_v13, %v374_v14  ;;  %vm388_vm5 = vcmp.ge.f32.partialorder %v364_v13, %v374_v14 }
 0x1a5   : > { %vm392_vm12 = vmand %vm388_vm5, %vm390_vm6 }
 0x1a6   : > { %v267_v35 = vadd.f32 %v1892_v29, %v261_v34  ;;  %vm382_vm3 = vcmp.ge.f32.partialorder %v364_v13, %v378_v15 }
 0x1a7   : > { %vm386_vm9 = vmand %vm382_vm3, %vm384_vm4 }
 0x1a8   : > { %2021 = vmatmul.mubr.msk.f32.vlgmr.msra.gmra.mrb[0].mxu1 %vm2953_vm0, %v267_v35  ;;  %vm394_vm15 = vmor %vm386_vm9, %vm392_vm12 }
 0x1a9   : > { %vm393_vm0 = vmor %vm385_vm13, %vm391_vm14  ;;  %v2817_v21 = vsel %vm394_vm15, 0.0, %v2546_v20 }
 0x1aa   : > { %v2819_v22 = vsel %vm393_vm0, 0.0, %v2546_v20  ;;  %vm2967_vm0 = vcmask 64512  }
 0x1ab   : > { %vm2968_vm3 = vmmov %vm2967_vm0 }
 0x1ac   : > { %vm2970_vm4 = vmmov %vm2967_vm0 }
 0x1ad   : > { %vm2971_vm5 = vmmov %vm2967_vm0 }
 0x1ae   : > { %vm2972_vm6 = vmmov %vm2967_vm0 }
 0x1af   : > { %vm2973_vm7 = vmmov %vm2967_vm0 }
 0x1b0   : > { %vm2974_vm8 = vmmov %vm2967_vm0 }
 0x1b1   : > { %vm2975_vm9 = vmmov %vm2967_vm0 }
 0x1b2   : > { %vm2976_vm10 = vmmov %vm2967_vm0 }
 0x27b   : > { %v2022_v37 = vpop.f32.mrb[0].mxu1 }
 0x27c   : > { %v2776_v38 = vadd.f32 %v2022_v37, %v1893_v36  ;;  %v348_v39 = vpop.f32.mrb[1].mxu1 }
 0x27d   : > { %v2778_v40 = vadd.f32 %v1893_v36, %v348_v39 }
 0x27f   : > { %2027 = vmatprep.mubr.msk.f32.mxu1 %vm2954_vm1, %v2778_v40  ;;  %v2784_v41 = vpack.i.bf16 %v2776_v38, %v2778_v40 }
 0x281   : > { %2298 = vrot.lane.b32.xlu1 %v2784_v41, %s2541_s18  ;;  %2293 = vrot.lane.b32.xlu0 %v2784_v41, %s2542_s20  ;;  %s2897_s18 = scalar_lea.hbm %s2949_s3, %s1945_s10  ;;  %s2553_s20 = smov [#allocation8]  }
 0x285   : > { %598 = vrot.lane.b32.xlu1 %v2778_v40, %s2543_s17  ;;  %2303 = vrot.lane.b32.xlu0 %v2784_v41, %s2544_s24 }
 0x289   : > { %600 = vrot.lane.b32.xlu1 %v2776_v38, %s2543_s17  ;;  %963 = vrot.lane.b32.xlu0 %v2776_v38, %s2545_s26  ;;  %s2466_s17 = sshll.u32 %s2553_s20, 4  ;;  %s2467_s17 = int_to_ptr.vmem [resolvable:$false] %s2466_s17 }
 0x28a   : > { %s2468_s24 = scalar_lea.vmem %s2467_s17, 512  ;;  %p2469_p7 = scmp.lt.s32.totalorder %s2899_s21, %s2467_s17 }
 0x28b   : > { %p2470_p9 = scmp.lt.s32.totalorder %s2468_s24, %s2462_s22 }
 0x28d   : > { %961 = vrot.lane.b32.xlu1 %v2778_v40, %s2545_s26  ;;  %p2471_p12 = por %p2470_p9, %p2469_p7 }
 0x28f   : > { %p2472_p2 = pnand %p2471_p12, %p2465_p3 }
 0x2f3   : > { %v2299_v42 = vpop.permute.xlu1 %2298  ;;  %v2294_v43 = vpop.permute.xlu0 %2293 }
 0x2f4   : > { %v2301_v44 = vunpack.i.h.bf16 %v2299_v42  ;;  %v2300_v45 = vunpack.i.l.bf16 %v2299_v42  ;;  %v2296_v46 = vunpack.i.h.bf16 %v2294_v43  ;;  %v2295_v47 = vunpack.i.l.bf16 %v2294_v43 }
 0x2f6   : > { %v2137_v49 = vpack.c.bf16 %v2296_v46, %v2295_v47  ;;  %v2147_v50 = vpack.c.bf16 %v2301_v44, %v2300_v45 }
 0x2f7   : > { %v2304_v51 = vpop.permute.xlu0 %2303  ;;  %v599_v52 = vpop.permute.xlu1 %598 }
 0x2f8   : > { %2139 = vmatprep.subr.msk.bf16.mxu1 %vm2795_vm2, %v2137_v49  ;;  %v2306_v53 = vunpack.i.h.bf16 %v2304_v51  ;;  %v2305_v54 = vunpack.i.l.bf16 %v2304_v51 }
 0x2f9   : > { %2142 = vmatpush3.bf16.xpose.msk.msra.mxu1 %vm2795_vm2, %v2137_v49 }
 0x2fa   : > { %2149 = vmatprep.subr.msk.bf16.mxu1 %vm2795_vm2, %v2147_v50  ;;  %v2157_v55 = vpack.c.bf16 %v2306_v53, %v2305_v54 }
 0x2fb   : > { %v601_v56 = vpop.permute.xlu1 %600  ;;  %v964_v58 = vpop.permute.xlu0 %963 }
 0x2ff   : > { %v962_v57 = vpop.permute.xlu1 %961 }
 0x300   : > { %2028 = vmatmul.mubr.msk.f32.vlgmr.msra.gmra.mrb[2].mxu1 %vm2954_vm1, %v2776_v38 }
 0x301   : > { %2152 = vmatpush3.bf16.xpose.msk.msra.mxu1 %vm2795_vm2, %v2147_v50  ;;  %2041 = vmatprep.mubr.msk.f32.mxu1 %vm2954_vm1, %v599_v52 }
 0x302   : > { %2159 = vmatprep.subr.msk.bf16.mxu1 %vm2795_vm2, %v2157_v55 }
 0x308   : > { %2042 = vmatmul.mubr.msk.f32.vlgmr.msra.gmra.mrb[4].mxu1 %vm2954_vm1, %v601_v56 }
 0x309   : > { %2162 = vmatpush3.bf16.xpose.msk.msra.mxu1 %vm2795_vm2, %v2157_v55  ;;  %2065 = vmatprep.mubr.msk.f32.mxu1 %vm2954_vm1, %v962_v57 }
 0x310   : > { %2066 = vmatmul.mubr.msk.f32.vlgmr.msra.gmra.mrb[6].mxu1 %vm2954_vm1, %v964_v58  ;;  %vm487_vm1 = vcmask 130048  }
 0x3d3   : > { %v2029_v23 = vpop.f32.mrb[2].mxu1 }
 0x3d4   : > { %v484_v24 = vadd.f32 %v2029_v23, %v2817_v21  ;;  %v478_v25 = vpop.f32.mrb[3].mxu1 }
 0x3d5   : > { %v479_v26 = vadd.f32 %v478_v25, %v2819_v22 }
 0x3d6   : > { %v491_v27 = vsel %vm487_vm1, %v484_v24, -inf }
 0x3d7   : > { %492 = vmax.xlane.f32.xlu0 %v491_v27  ;;  %v488_v28 = vsel %vm487_vm1, %v479_v26, -inf }
 0x3d8   : > { %489 = vmax.xlane.f32.xlu1 %v488_v28 }
 0x3db   : > { %v2043_v29 = vpop.f32.mrb[4].mxu1 }
 0x3dc   : > { %v680_v30 = vpop.f32.mrb[5].mxu1  ;;  %v686_v32 = vadd.f32 %v2043_v29, %v2817_v21 }
 0x3dd   : > { %v681_v31 = vadd.f32 %v680_v30, %v2819_v22 }
 0x3de   : > { %v692_v35 = vsel %vm487_vm1, %v686_v32, -inf }
 0x3df   : > { %v689_v33 = vsel %vm487_vm1, %v681_v31, -inf }
 0x3e0   : > { %690 = vmax.xlane.f32.xlu0 %v689_v33 }
 0x3e3   : > { %v2067_v34 = vpop.f32.mrb[6].mxu1 }
 0x3e4   : > { %v1043_v36 = vpop.f32.mrb[7].mxu1  ;;  %693 = vmax.xlane.f32.xlu0 %v692_v35  ;;  %v1049_v63 = vadd.f32 %v2067_v34, %v2817_v21 }
 0x3e5   : > { %v1044_v61 = vadd.f32 %v1043_v36, %v2819_v22 }
 0x3e6   : > { %v1055_v2 = vsel %vm487_vm1, %v1049_v63, -inf }
 0x3e7   : > { %v1052_v62 = vsel %vm487_vm1, %v1044_v61, -inf }
 0x464   : > { %v493_v37 = vpop.xlane.xlu0 %492 }
 0x465   : > { %v495_v39 = vsub.f32 %v484_v24, %v493_v37  ;;  %v490_v42 = vpop.xlane.xlu1 %489 }
 0x466   : > { %v494_v43 = vsub.f32 %v479_v26, %v490_v42  ;;  %v597_v42 = vld [vmem:[#allocation5 + $0x8] sm:$0xff] }
 0x467   : > { %v498_v44 = vmul.f32 1.442695, %v495_v39  ;;  %v798_v39 = vld [vmem:[#allocation5 + $0x28] sm:$0xff] }
 0x468   : > { %v496_v45 = vmul.f32 1.442695, %v494_v43 }
 0x469   : > { %2336 = vpow2.f32 %v498_v44 }
 0x46a   : > { %2338 = vpow2.f32 %v496_v45 }
 0x46d   : > { %v691_v46 = vpop.xlane.xlu0 %690 }
 0x46e   : > { %v695_v47 = vsub.f32 %v681_v31, %v691_v46 }
 0x470   : > { %v697_v49 = vmul.f32 1.442695, %v695_v47 }
 0x471   : > { %v694_v50 = vpop.xlane.xlu0 %693 }
 0x472   : > { %2340 = vpow2.f32 %v697_v49  ;;  %v696_v51 = vsub.f32 %v686_v32, %v694_v50 }
 0x473   : > { %v2337_v52 = vpop.eup %2336 }
 0x474   : > { %v2339_v53 = vpop.eup %2338  ;;  %v699_v54 = vmul.f32 1.442695, %v696_v51  ;;  %v503_v55 = vsel %vm487_vm1, %v2337_v52, 0.0 }
 0x475   : > { %504 = vadd.xlane.f32.xlu0 %v503_v55  ;;  %v500_v56 = vsel %vm487_vm1, %v2339_v53, 0.0 }
 0x476   : > { %2342 = vpow2.f32 %v699_v54  ;;  %501 = vadd.xlane.f32.xlu1 %v500_v56 }
 0x47c   : > { %v2341_v57 = vpop.eup %2340 }
 0x47d   : > { %v701_v58 = vsel %vm487_vm1, %v2341_v57, 0.0 }
 0x47e   : > { %702 = vadd.xlane.f32.xlu1 %v701_v58 }
 0x480   : > { %v2343_v59 = vpop.eup %2342 }
 0x481   : > { %v704_v60 = vsel %vm487_vm1, %v2343_v59, 0.0 }
 0x482   : > { %705 = vadd.xlane.f32.xlu0 %v704_v60 }
 0x48f   : > { %2308 = vrot.lane.b32.xlu1 %v2784_v41, %s2547_s27 }
 0x493   : > { %2318 = vrot.lane.b32.xlu1 %v2784_v41, %s2548_s23 }
 0x497   : > { %1245 = vrot.lane.b32.xlu1 %v2778_v40, %s2549_s5 }
 0x498   : > { %2313 = vrot.lane.b32.xlu0 %v2784_v41, %s2550_s8 }
 0x49b   : > { %1247 = vrot.lane.b32.xlu1 %v2776_v38, %s2549_s5 }
 0x4b7   : > { %1053 = vmax.xlane.f32.xlu0 %v1052_v62 }
 0x4bf   : > { %1056 = vmax.xlane.f32.xlu1 %v1055_v2 }
 0x502   : > { %v505_v4 = vpop.xlane.xlu0 %504 }
 0x503   : > { %v502_v3 = vpop.xlane.xlu1 %501 }
 0x504   : > { %2344 = vrcp.f32 %v502_v3 }
 0x505   : > { %2346 = vrcp.f32 %v505_v4 }
 0x50b   : > { %v703_v40 = vpop.xlane.xlu1 %702 }
 0x50c   : > { %2348 = vrcp.f32 %v703_v40 }
 0x50e   : > { %v2345_v5 = vpop.eup %2344 }
 0x50f   : > { %v706_v6 = vpop.xlane.xlu0 %705  ;;  %v2309_v7 = vpop.permute.xlu1 %2308  ;;  %v508_v38 = vmul.f32 %v2345_v5, %v2339_v53 }
 0x510   : > { %2350 = vrcp.f32 %v706_v6  ;;  %v2311_v8 = vunpack.i.h.bf16 %v2309_v7  ;;  %v2310_v9 = vunpack.i.l.bf16 %v2309_v7  ;;  %v2347_v11 = vpop.eup %2346 }
 0x511   : > { %2034 = vmatprep.mubr.msk.f32.mxu0 %vm487_vm1, %v508_v38  ;;  %v509_v23 = vmul.f32 %v2347_v11, %v2337_v52 }
 0x512   : > { %v2143_v10 = vpack.c.bf16 %v2311_v8, %v2310_v9 }
 0x513   : > { %v2314_v12 = vpop.permute.xlu0 %2313  ;;  %v2319_v13 = vpop.permute.xlu1 %2318 }
 0x514   : > { %v2316_v14 = vunpack.i.h.bf16 %v2314_v12  ;;  %v2315_v15 = vunpack.i.l.bf16 %v2314_v12  ;;  %v2321_v16 = vunpack.i.h.bf16 %v2319_v13  ;;  %v2320_v17 = vunpack.i.l.bf16 %v2319_v13  ;;  %2144 = vmatprep.subr.bf16.mxu0 %v2143_v10 }
 0x515   : > { %2146 = vmatpush3.bf16.msra.mxu0 %v2143_v10 }
 0x516   : > { %v2349_v18 = vpop.eup %2348  ;;  %v2153_v19 = vpack.c.bf16 %v2316_v14, %v2315_v15  ;;  %v2167_v20 = vpack.c.bf16 %v2321_v16, %v2320_v17  ;;  %v1445_v17 = vld [vmem:[#allocation5 + $0x68] sm:$0xff] }
 0x517   : > { %v1246_v24 = vpop.permute.xlu1 %1245  ;;  %v709_v25 = vmul.f32 %v2349_v18, %v2341_v57 }
 0x518   : > { %2035 = vmatmul.mubr.msk.f32.vlgmr.msra.gmra.mrb[0].mxu0 %vm487_vm1, %v509_v23  ;;  %2154 = vmatprep.subr.bf16.mxu0 %v2153_v19 }
 0x519   : > { %2169 = vmatprep.subr.msk.bf16.mxu1 %vm2795_vm2, %v2167_v20  ;;  %2084 = vmatprep.mubr.msk.f32.mxu1 %vm2967_vm0, %v1246_v24 }
 0x51a   : > { %v2351_v26 = vpop.eup %2350  ;;  %2156 = vmatpush3.bf16.msra.mxu0 %v2153_v19  ;;  %2048 = vmatprep.mubr.msk.f32.mxu0 %vm487_vm1, %v709_v25  ;;  %v1930_v25 = vld [vmem:[#allocation7 + $0x1] ss:$0 sm:$0xff] }
 0x51b   : > { %v710_v27 = vmul.f32 %v2351_v26, %v2343_v59  ;;  %2172 = vmatpush3.bf16.xpose.msk.msra.mxu1 %vm2795_vm2, %v2167_v20  ;;  %v1248_v28 = vpop.permute.xlu1 %1247  ;;  %2051 = vmatprep.subr.mxu0 %v798_v39  ;;  %vm2969_vm2 = vmmov %vm2967_vm0  ;;  %vm1686_vm0 = vcmask 523264  }
 0x51d   : > { %2049 = vmatmul.mubr.msk.f32.vlgmr.msra.gmra.mrb[2].mxu0 %vm487_vm1, %v710_v27 }
 0x51e   : > { %2052 = vmatpush3.msra.mxu0 %v798_v39 }
 0x51f   : > { %2056 = vmatprep.subr.mxu0 %v597_v42 }
 0x522   : > { %2085 = vmatmul.mubr.msk.f32.vlgmr.msra.gmra.mrb[8].mxu1 %vm2968_vm3, %v1248_v28 }
 0x544   : > { %v1054_v29 = vpop.xlane.xlu0 %1053 }
 0x545   : > { %v1058_v30 = vsub.f32 %v1044_v61, %v1054_v29 }
 0x547   : > { %v1060_v33 = vmul.f32 1.442695, %v1058_v30 }
 0x54c   : > { %v1057_v31 = vpop.xlane.xlu1 %1056 }
 0x54d   : > { %v1059_v32 = vsub.f32 %v1049_v63, %v1057_v31 }
 0x54f   : > { %v1062_v34 = vmul.f32 1.442695, %v1059_v32 }
 0x551   : > { %2352 = vpow2.f32 %v1062_v34 }
 0x552   : > { %2354 = vpow2.f32 %v1060_v33 }
 0x55b   : > { %v2353_v35 = vpop.eup %2352 }
 0x55c   : > { %v1067_v36 = vsel %vm487_vm1, %v2353_v35, 0.0  ;;  %v2355_v37 = vpop.eup %2354 }
 0x55d   : > { %1068 = vadd.xlane.f32.xlu0 %v1067_v36  ;;  %v1064_v48 = vsel %vm487_vm1, %v2355_v37, 0.0 }
 0x561   : > { %1065 = vadd.xlane.f32.xlu0 %v1064_v48 }
 0x577   : > { %2323 = vrot.lane.b32.xlu0 %v2784_v41, %s2551_s9 }
 0x5ea   : > { %v1069_v43 = vpop.xlane.xlu0 %1068 }
 0x5eb   : > { %v2036_v44 = vpop.f32.mrb[0].mxu0 }
 0x5ec   : > { %v588_v45 = vpop.f32.mrb[1].mxu0 }
 0x5ee   : > { %v1066_v46 = vpop.xlane.xlu0 %1065 }
 0x5ef   : > { %2356 = vrcp.f32 %v1066_v46 }
 0x5f0   : > { %2358 = vrcp.f32 %v1069_v43  ;;  %v2050_v47 = vpop.f32.mrb[2].mxu0 }
 0x5f1   : > { %v789_v49 = vpop.f32.mrb[3].mxu0 }
 0x5f2   : > { %v2324_v50 = vpop.permute.xlu0 %2323  ;;  %2053 = vmatprep.mubr.msk.f32.mxu0 %vm2969_vm2, %v789_v49  ;;  %v1578_v49 = vld [vmem:[#allocation5 + $0x70] sm:$0xff] }
 0x5f3   : > { %v2326_v51 = vunpack.i.h.bf16 %v2324_v50  ;;  %v2325_v52 = vunpack.i.l.bf16 %v2324_v50  ;;  %2054 = vmatmul.mubr.msk.f32.vlgmr.msra.gmra.mrb[4].mxu0 %vm2970_vm4, %v2050_v47  ;;  %v1577_v47 = vld [vmem:[#allocation5 + $0x50] sm:$0xff] }
 0x5f4   : > { %2058 = vmatprep.mubr.msk.f32.mxu0 %vm2971_vm5, %v588_v45  ;;  %2057 = vmatpush3.msra.mxu0 %v597_v42  ;;  %v1576_v45 = vld [vmem:[#allocation5 + $0x30] sm:$0xff]  ;;  %v2181_v50 = vpack.c.bf16 %v1578_v49, %v1577_v47 }
 0x5f5   : > { %v2163_v53 = vpack.c.bf16 %v2326_v51, %v2325_v52  ;;  %v2086_v54 = vpop.f32.mrb[8].mxu1 }
 0x5f6   : > { %v1327_v55 = vpop.f32.mrb[9].mxu1  ;;  %v1333_v58 = vadd.f32 %v2086_v54, %v2817_v21 }
 0x5f7   : > { %v1328_v56 = vadd.f32 %v1327_v55, %v2819_v22  ;;  %2164 = vmatprep.subr.bf16.mxu0 %v2163_v53  ;;  %v1161_v22 = vld [vmem:[#allocation5 + $0x48] sm:$0xff] }
 0x5f8   : > { %v1339_v63 = vsel %vm487_vm1, %v1333_v58, -inf }
 0x5f9   : > { %v2357_v57 = vpop.eup %2356  ;;  %v1336_v59 = vsel %vm487_vm1, %v1328_v56, -inf }
 0x5fa   : > { %v2359_v60 = vpop.eup %2358  ;;  %1337 = vmax.xlane.f32.xlu1 %v1336_v59  ;;  %v1072_v61 = vmul.f32 %v2357_v57, %v2355_v37 }
 0x5fb   : > { %2059 = vmatmul.mubr.msk.f32.vlgmr.msra.gmra.mrb[4].mxu0 %vm2972_vm6, %v2036_v44  ;;  %v1073_v62 = vmul.f32 %v2359_v60, %v2353_v35  ;;  %v1575_v44 = vld [vmem:[#allocation5 + $0x10] sm:$0xff]  ;;  %v1932_v60 = vld [vmem:[#allocation7 + $0x5] ss:$0 sm:$0xff] }
 0x5fc   : > { %2166 = vmatpush3.bf16.msra.mxu0 %v2163_v53  ;;  %2072 = vmatprep.mubr.msk.f32.mxu0 %vm487_vm1, %v1072_v61  ;;  %v2177_v46 = vpack.c.bf16 %v1576_v45, %v1575_v44 }
 0x5fd   : > { %2075 = vmatprep.subr.mxu0 %v1161_v22 }
 0x5fe   : > { %1340 = vmax.xlane.f32.xlu1 %v1339_v63  ;;  %2178 = vmatprep.subr.bf16.mxu1 %v2177_v46 }
 0x5ff   : > { %2073 = vmatmul.mubr.msk.f32.vlgmr.msra.gmra.mrb[6].mxu0 %vm487_vm1, %v1073_v62  ;;  %2180 = vmatpush3.bf16.msra.mxu1 %v2177_v46 }
 0x600   : > { %2076 = vmatpush3.msra.mxu0 %v1161_v22  ;;  %2182 = vmatprep.subr.bf16.mxu1 %v2181_v50 }
 0x603   : > { %2184 = vmatpush3.bf16.msra.mxu1 %v2181_v50 }
 0x687   : > { %v1338_v21 = vpop.xlane.xlu1 %1337 }
 0x688   : > { %v1342_v2 = vsub.f32 %v1328_v56, %v1338_v21 }
 0x68a   : > { %v1344_v40 = vmul.f32 1.442695, %v1342_v2 }
 0x68b   : > { %v1341_v3 = vpop.xlane.xlu1 %1340 }
 0x68c   : > { %v1343_v4 = vsub.f32 %v1333_v58, %v1341_v3  ;;  %v1931_v58 = vld [vmem:[#allocation7 + $0x4] ss:$0 sm:$0xff]  ;;  %v1674_v3 = vld [vmem:[#allocation5 + $0x18] sm:$0xff] }
 0x68e   : > { %v1346_v5 = vmul.f32 1.442695, %v1343_v4  ;;  %v1675_v4 = vld [vmem:[#allocation5 + $0x38] sm:$0xff] }
 0x690   : > { %2360 = vpow2.f32 %v1346_v5  ;;  %v1676_v5 = vld [vmem:[#allocation5 + $0x58] sm:$0xff] }
 0x691   : > { %2362 = vpow2.f32 %v1344_v40  ;;  %v2185_v40 = vpack.c.bf16 %v1675_v4, %v1674_v3 }
 0x69a   : > { %v2361_v6 = vpop.eup %2360 }
 0x69b   : > { %v1351_v7 = vsel %vm487_vm1, %v2361_v6, 0.0  ;;  %v2363_v38 = vpop.eup %2362 }
 0x69c   : > { %1352 = vadd.xlane.f32.xlu1 %v1351_v7  ;;  %v1348_v8 = vsel %vm487_vm1, %v2363_v38, 0.0 }
 0x6a0   : > { %1349 = vadd.xlane.f32.xlu1 %v1348_v8  ;;  %v1679_v8 = vld [vmem:[#allocation5 + $0xb8] sm:$0xff] }
 0x6b1   : > { %2328 = vrot.lane.b32.xlu1 %v2784_v41, %s2552_s25 }
 0x6d2   : > { %v2074_v9 = vpop.f32.mrb[6].mxu0 }
 0x6d3   : > { %v1152_v10 = vpop.f32.mrb[7].mxu0 }
 0x6d4   : > { %2077 = vmatprep.mubr.msk.f32.mxu0 %vm2973_vm7, %v1152_v10  ;;  %v1680_v10 = vld [vmem:[#allocation5 + $0xd8] sm:$0xff] }
 0x6d5   : > { %2078 = vmatmul.mubr.msk.f32.vlgmr.msra.gmra.mrb[4].mxu0 %vm2974_vm8, %v2074_v9 }
 0x729   : > { %v1353_v11 = vpop.xlane.xlu1 %1352 }
 0x72a   : > { %2364 = vrcp.f32 %v1353_v11  ;;  %v1681_v11 = vld [vmem:[#allocation5 + $0xf8] sm:$0xff] }
 0x72d   : > { %v1350_v12 = vpop.xlane.xlu1 %1349 }
 0x72e   : > { %2366 = vrcp.f32 %v1350_v12  ;;  %v2197_v12 = vpack.c.bf16 %v1681_v11, %v1680_v10 }
 0x731   : > { %v2329_v13 = vpop.permute.xlu1 %2328 }
 0x732   : > { %v2331_v14 = vunpack.i.h.bf16 %v2329_v13  ;;  %v2330_v15 = vunpack.i.l.bf16 %v2329_v13  ;;  %v1933_v13 = vld [vmem:[#allocation7 + $0x6] ss:$0 sm:$0xff] }
 0x734   : > { %v2173_v16 = vpack.c.bf16 %v2331_v14, %v2330_v15  ;;  %v2365_v18 = vpop.eup %2364 }
 0x735   : > { %v1357_v20 = vmul.f32 %v2365_v18, %v2361_v6  ;;  %v1677_v6 = vld [vmem:[#allocation5 + $0x78] sm:$0xff] }
 0x736   : > { %2174 = vmatprep.subr.bf16.mxu0 %v2173_v16  ;;  %v2189_v7 = vpack.c.bf16 %v1677_v6, %v1676_v5 }
 0x737   : > { %2176 = vmatpush3.bf16.msra.mxu0 %v2173_v16 }
 0x738   : > { %v2367_v19 = vpop.eup %2366  ;;  %2094 = vmatprep.subr.mxu0 %v1445_v17 }
 0x739   : > { %v1356_v41 = vmul.f32 %v2367_v19, %v2363_v38  ;;  %v1678_v38 = vld [vmem:[#allocation5 + $0x98] sm:$0xff] }
 0x73a   : > { %v2193_v9 = vpack.c.bf16 %v1679_v8, %v1678_v38 }
 0x73b   : > { %2091 = vmatprep.mubr.msk.f32.mxu0 %vm487_vm1, %v1356_v41 }
 0x73c   : > { %2092 = vmatmul.mubr.msk.f32.vlgmr.msra.gmra.mrb[8].mxu0 %vm487_vm1, %v1357_v20  ;;  %vm2977_vm1 = vcmask 261120  }
 0x73d   : > { %2095 = vmatpush3.msra.mxu0 %v1445_v17  ;;  %vm2978_vm11 = vmmov %vm2977_vm1 }
 0x73e   : > { %vm2979_vm12 = vmmov %vm2977_vm1  ;;  %2186 = vmatprep.subr.bf16.mxu0 %v2185_v40 }
 0x73f   : > { %vm2980_vm13 = vmmov %vm2977_vm1 }
 0x740   : > { %vm2981_vm14 = vmmov %vm2977_vm1 }
 0x741   : > { %vm2982_vm15 = vmmov %vm2977_vm1 }
 0x742   : > { %vm2983_vm3 = vmmov %vm2977_vm1 }
 0x743   : > { %vm2984_vm2 = vmmov %vm2977_vm1 }
 0x80f   : > { %v2093_v23 = vpop.f32.mrb[8].mxu0 }
 0x810   : > { %v1436_v24 = vpop.f32.mrb[9].mxu0 }
 0x811   : > { %2096 = vmatprep.mubr.msk.f32.mxu0 %vm2975_vm9, %v1436_v24 }
 0x812   : > { %2097 = vmatmul.mubr.msk.f32.vlgmr.msra.gmra.mrb[4].mxu0 %vm2976_vm10, %v2093_v23 }
 0x813   : > { %2188 = vmatpush3.bf16.msra.mxu0 %v2185_v40 }
 0x814   : > { %2190 = vmatprep.subr.bf16.mxu0 %v2189_v7 }
 0x817   : > { %2192 = vmatpush3.bf16.msra.mxu0 %v2189_v7 }
 0x818   : > { %2194 = vmatprep.subr.bf16.mxu0 %v2193_v9 }
 0x81b   : > { %2196 = vmatpush3.bf16.msra.mxu0 %v2193_v9 }
 0x81c   : > { %2198 = vmatprep.subr.bf16.mxu0 %v2197_v12 }
 0x81f   : > { %2200 = vmatpush3.bf16.msra.mxu0 %v2197_v12 }
 0x8e5   : > { %v2098_v26 = vpop.f32.mrb[4].mxu0 }
 0x8e6   : > { %v1530_v27 = vadd.f32 %v2098_v26, %v2764_v1  ;;  %v1518_v28 = vpop.f32.mrb[5].mxu0 }
 0x8e7   : > { %v1529_v29 = vadd.f32 %v1518_v28, %v2762_v0 }
 0x8e8   : > { %v2876_v30 = vadd.f32 %v1930_v25, %v1530_v27 }
 0x8e9   : > { %v2878_v31 = vadd.f32 %v1930_v25, %v1529_v29  ;;  %v1936_v29 = vld [vmem:[#allocation7 + $0x7] ss:$0 sm:$0xff] }
 0x8ea   : > { %v1540_v32 = vsel %vm2977_vm1, %v2876_v30, 0.0 }
 0x8eb   : > { %1541 = vadd.xlane.f32.xlu1 %v1540_v32  ;;  %v1537_v33 = vsel %vm2978_vm11, %v2878_v31, 0.0 }
 0x8ec   : > { %1538 = vadd.xlane.f32.xlu0 %v1537_v33 }
 0x978   : > { %v1542_v34 = vpop.xlane.xlu1 %1541 }
 0x979   : > { %v1544_v35 = vmul.f32 0.03125, %v1542_v34  ;;  %v1539_v36 = vpop.xlane.xlu0 %1538 }
 0x97a   : > { %v1543_v37 = vmul.f32 0.03125, %v1539_v36 }
 0x97b   : > { %v1546_v1 = vsub.f32 %v2876_v30, %v1544_v35 }
 0x97c   : > { %v1545_v0 = vsub.f32 %v2878_v31, %v1543_v37 }
 0x97d   : > { %v1548_v42 = vmul.f32 %v1546_v1, %v1546_v1 }
 0x97e   : > { %v1547_v48 = vmul.f32 %v1545_v0, %v1545_v0 }
 0x97f   : > { %v1552_v43 = vsel %vm2980_vm13, %v1548_v42, 0.0 }
 0x980   : > { %v1549_v39 = vsel %vm2979_vm12, %v1547_v48, 0.0 }
 0x981   : > { %1550 = vadd.xlane.f32.xlu0 %v1549_v39 }
 0x985   : > { %1553 = vadd.xlane.f32.xlu0 %v1552_v43 }
 0xa0e   : > { %v1551_v51 = vpop.xlane.xlu0 %1550 }
 0xa0f   : > { %v1555_v52 = vmul.f32 0.03125, %v1551_v51 }
 0xa11   : > { %v1557_v53 = vadd.f32 1e-05, %v1555_v52 }
 0xa12   : > { %v1554_v54 = vpop.xlane.xlu0 %1553 }
 0xa13   : > { %2368 = vrsqrt.f32 %v1557_v53  ;;  %v1556_v55 = vmul.f32 0.03125, %v1554_v54 }
 0xa15   : > { %v1558_v56 = vadd.f32 1e-05, %v1556_v55 }
 0xa17   : > { %2370 = vrsqrt.f32 %v1558_v56 }
 0xa1d   : > { %v2369_v57 = vpop.eup %2368 }
 0xa1e   : > { %v1561_v59 = vmul.f32 %v2369_v57, %v1545_v0 }
 0xa20   : > { %v1567_v61 = vmul.f32 %v1931_v58, %v1561_v59 }
 0xa21   : > { %v2371_v62 = vpop.eup %2370 }
 0xa22   : > { %v1562_v63 = vmul.f32 %v2371_v62, %v1546_v1  ;;  %v1573_v22 = vadd.f32 %v1932_v60, %v1567_v61 }
 0xa24   : > { %v1568_v21 = vmul.f32 %v1931_v58, %v1562_v63  ;;  %2107 = vmatprep.mubr.msk.f32.mxu1 %vm2981_vm14, %v1573_v22 }
 0xa26   : > { %v1574_v2 = vadd.f32 %v1932_v60, %v1568_v21 }
 0xa28   : > { %2108 = vmatmul.mubr.msk.f32.vlgmr.msra.gmra.mrb[10].mxu1 %vm2982_vm15, %v1574_v2 }
 0xafb   : > { %v2109_v14 = vpop.f32.mrb[10].mxu1 }
 0xafc   : > { %v1661_v15 = vadd.f32 %v2109_v14, %v1933_v13  ;;  %v1655_v16 = vpop.f32.mrb[11].mxu1 }
 0xafd   : > { %v1656_v17 = vadd.f32 %v1933_v13, %v1655_v16 }
 0xafe   : > { %v1667_v18 = vmul.f32 0.70710677, %v1661_v15  ;;  %v1665_v26 = vmul.f32 0.5, %v1661_v15 }
 0xaff   : > { %v1666_v19 = vmul.f32 0.70710677, %v1656_v17  ;;  %v1664_v24 = vmul.f32 0.5, %v1656_v17 }
 0xb00   : > { %2372 = verf.f32 %v1667_v18 }
 0xb01   : > { %2374 = verf.f32 %v1666_v19 }
 0xb0a   : > { %v2373_v41 = vpop.eup %2372 }
 0xb0b   : > { %v2375_v20 = vpop.eup %2374  ;;  %v1671_v23 = vadd.f32 1.0, %v2373_v41 }
 0xb0c   : > { %v1670_v25 = vadd.f32 1.0, %v2375_v20 }
 0xb0d   : > { %v1673_v28 = vmul.f32 %v1671_v23, %v1665_v26 }
 0xb0e   : > { %v1672_v27 = vmul.f32 %v1670_v25, %v1664_v24 }
 0xb10   : > { %2126 = vmatprep.mubr.msk.f32.mxu0 %vm1686_vm0, %v1672_v27 }
 0xb11   : > { %2127 = vmatmul.mubr.msk.f32.vlgmr.msra.gmra.mrb[10].mxu0 %vm1686_vm0, %v1673_v28 }
 0xbe4   : > { %v2128_v32 = vpop.f32.mrb[10].mxu0 }
 0xbe5   : > { %v1765_v33 = vadd.f32 %v2128_v32, %v1936_v29  ;;  %v1759_v34 = vpop.f32.mrb[11].mxu0 }
 0xbe6   : > { %v1760_v35 = vadd.f32 %v1936_v29, %v1759_v34 }
 0xbe7   : > { %v1769_v36 = vadd.f32 %v1765_v33, %v2876_v30 }
 0xbe8   : > { %v1768_v37 = vadd.f32 %v1760_v35, %v2878_v31 }
 0xbe9   : > { %1771 = vst.msk [vmem:[%s215_s11 + $0x8] sm:$0xff] %vm2983_vm3, %v1769_v36 }
 0xbea   : > { %1770 = vst.msk [vmem:[%s215_s11] sm:$0xff] %vm2984_vm2, %v1768_v37 }
 0xbeb   : > { %2475 = shalt.err (!%p2472_p2)
}
 0xbec   : > { %s2476_s26 = scalar_lea.hbm %s2897_s18, 256  ;;  %s2480_s5 = scalar_lea.hbm %s2949_s3, 512 }
 0xbed   : > { %p2477_p13 = scmp.ne.s32.totalorder %s2897_s18, %s2476_s26  ;;  %p2481_p4 = scmp.lt.u32.totalorder %s2897_s18, %s2949_s3 }
 0xbee   : > { %p2482_p5 = scmp.lt.u32.totalorder %s2480_s5, %s2476_s26  ;;  %p2484_p11 = scmp.lt.u32.totalorder %s2476_s26, %s2897_s18 }
 0xbef   : > { %p2478_p6 = pnand %p2477_p13, %p2985_p0 }
 0xbf0   : > { %p2483_p8 = por %p2482_p5, %p2481_p4 }
 0xbf1   : > { %p2479_p10 = pneg %p2478_p6 }
 0xbf2   : > { %p2485_p1 = por %p2484_p11, %p2483_p8 }
 0xbf4   : > { %p2486_p3 = pnand %p2485_p1, %p2479_p10 }
 0xbf6   : > { %2489 = shalt.err (!%p2486_p3)
}
 0xbf7   : > { %s2554_s25 = smov 128   ;;  %s2555_s10 = smov 8  }
 0xbf8   : > { %2217 = dma.vmem_to_hbm [thread:$0]  (%p2985_p0), %s2899_s21, 256, %s2897_s18, %s1773_s16, %s2554_s25, %s2554_s25, %s2555_s10  }
 0xbf9 PF: > { %s1801_s11 = sand.u32 1, %s2520_s12   ;;  %p2986_p7 = scmp.ne.s32.totalorder %s2956_s19, 0 }
 0xbfa   : > { %p2987_p9 = scmp.ge.s32.totalorder %s2532_s15, 2  ;;  %s1802_s29 = scalar_lea.sflag [#allocation4], %s1801_s11 }
 0xbfc   : > { %p2231_p12 = pnand %p2987_p9, %p2986_p7 }
 0xbfe   : > { %2515 = dma.done.wait (!%p2231_p12), %s1802_s29, 256  }
 0xbff   : > { %2517 = vsyncadd (!%p2231_p12), %s1802_s29, 4294967040  ;;  %p17_p2 = scmp.ge.s32.totalorder %s2686_s4, 4   ;;  %s2988_s12 = smov %s2524_s13 }
 0xc00   : > { %s2989_s13 = smov %s2528_s14  ;;  %s2990_s14 = smov %s2702_s7 }
 0xc01   : > { %s2991_s15 = smov %s2686_s4  ;;  %19 = sbr.rel (!%p17_p2) target bundleno = 6 (0x6), region = 85 }
 0xc08   :  { %1807 = vsyncpa [#allocation3], 1 }
 0xc09   :  { %1809 = vsyncpa [#allocation3 + $0x1], 1 }
 0xc0a   :  { %1810 = vsyncpa [#allocation6], 1 }
 0xc0b   :  { %1811 = vsyncpa [#allocation4], 1 }
 0xc0c   :  { %1813 = vsyncpa [#allocation4 + $0x1], 1 }

</bundles_post_ra>
